<compile_context>
chip_gen: v6e
topology: v6e:2x2x1
jax: 0.10.0
libtpu: 0.0.40
codegen_flags: <defaults>
</compile_context>

<pallas_src>
import jax
import jax.numpy as jnp
from jax.experimental import pallas as pl
from jax.experimental.pallas import tpu as pltpu

IN_DIM = 5 * 10 * 10   # 500
HID = 200
OUT_DIM = 10 * 10      # 100
OUT_PAD = 128          # lane-dense padded output width
MAX_TB = 2048          # batch tile; ~14 MB VMEM footprint, well under 32 MiB


def _mlp_kernel(x_ref, w1_ref, b1_ref, w2_ref, b2_ref, w3_ref, b3_ref,
                w4_ref, b4_ref, o_ref):
    # Cast the f32 input tile to bf16 on the VPU (hidden under the MXU),
    # instead of a separate XLA cast pass over HBM in the wrapper.
    x = x_ref[...].astype(jnp.bfloat16)
    # fc1 + relu  (bf16 matmul, f32 accumulate, f32 epilogue)
    h = jnp.dot(x, w1_ref[...], preferred_element_type=jnp.float32)
    h = jnp.maximum(h + b1_ref[...], 0.0)
    # fc2 + relu
    h = jnp.dot(h.astype(jnp.bfloat16), w2_ref[...],
                preferred_element_type=jnp.float32)
    h = jnp.maximum(h + b2_ref[...], 0.0)
    # fc3 + relu
    h = jnp.dot(h.astype(jnp.bfloat16), w3_ref[...],
                preferred_element_type=jnp.float32)
    h = jnp.maximum(h + b3_ref[...], 0.0)
    # fc4 + sigmoid (padded to 128 lanes -> unmasked, lane-dense stores)
    h = jnp.dot(h.astype(jnp.bfloat16), w4_ref[...],
                preferred_element_type=jnp.float32)
    o_ref[...] = jax.nn.sigmoid(h + b4_ref[...])


def _cores_per_chip():
    # v7x exposes 2 TensorCores behind one device; v5e/v6e have 1.
    try:
        kind = jax.devices()[0].device_kind.lower()
    except Exception:  # pragma: no cover - defensive
        return 1
    return 2 if "v7" in kind else 1


def _batch_tile(b, n_cores):
    if b <= 16:
        return b  # full-extent block is always legal
    # At least n_cores grid steps so the "parallel" axis shards across TCs.
    tb = min(MAX_TB, pl.cdiv(b, max(n_cores, 1)))
    tb = ((tb + 15) // 16) * 16        # 16-sublane alignment (bf16 packing)
    return min(b, tb)


def prepare_params(params):
    """One-time weight packing (hoisted out of the per-call path).

    params: ((w1, b1), ..., (w4, b4)) with w_i of shape (in, out).
    Returns packed arrays ready for fully_connected_nn().
    """
    (w1, b1), (w2, b2), (w3, b3), (w4, b4) = params
    w1b = w1.astype(jnp.bfloat16)
    w2b = w2.astype(jnp.bfloat16)
    w3b = w3.astype(jnp.bfloat16)
    # Zero-pad the final layer's output dim 100 -> 128 (bit-exact for the
    # first 100 columns).
    w4p = jnp.zeros((HID, OUT_PAD), jnp.bfloat16).at[:, :OUT_DIM].set(
        w4.astype(jnp.bfloat16))
    b4p = jnp.zeros((1, OUT_PAD), jnp.float32).at[:, :OUT_DIM].set(
        b4.reshape(1, OUT_DIM).astype(jnp.float32))
    # Biases as (1, N) f32 rows so they broadcast over the batch tile.
    b1r = b1.reshape(1, HID).astype(jnp.float32)
    b2r = b2.reshape(1, HID).astype(jnp.float32)
    b3r = b3.reshape(1, HID).astype(jnp.float32)
    packed = (w1b, b1r, w2b, b2r, w3b, b3r, w4p, b4p)
    return jax.tree_util.tree_map(jax.block_until_ready, packed)


def fully_connected_nn(x, packed_params, *, return_padded=False):
    """x: (B, 5, 10, 10) float32 -> (B, 10, 10) float32.

    If return_padded=True, returns the raw (B, 128) kernel output (columns
    >= 100 are garbage) to let the consumer fuse its own slice.
    """
    b = x.shape[0]
    x_flat = x.reshape(b, IN_DIM)            # same order as nn.Flatten (NCHW)

    n_cores = _cores_per_chip()
    tb = _batch_tile(b, n_cores)
    grid = (pl.cdiv(b, tb),)

    def resident(shape):
        # Same block every grid step -> stays VMEM-resident (DMA'd once).
        return pl.BlockSpec(shape, lambda i: (0, 0))

    flops = 2 * b * (IN_DIM * HID + HID * HID + HID * HID + HID * OUT_PAD)
    bytes_accessed = (
        b * IN_DIM * 4 + b * OUT_PAD * 4                       # f32 activations
        + 2 * (IN_DIM * HID + 2 * HID * HID + HID * OUT_PAD)   # bf16 weights
        + 4 * (3 * HID + OUT_PAD))                             # f32 biases

    out = pl.pallas_call(
        _mlp_kernel,
        out_shape=jax.ShapeDtypeStruct((b, OUT_PAD), jnp.float32),
        grid=grid,
        in_specs=[
            pl.BlockSpec((tb, IN_DIM), lambda i: (i, 0)),      # f32 x tile
            resident((IN_DIM, HID)), resident((1, HID)),
            resident((HID, HID)), resident((1, HID)),
            resident((HID, HID)), resident((1, HID)),
            resident((HID, OUT_PAD)), resident((1, OUT_PAD)),
        ],
        out_specs=pl.BlockSpec((tb, OUT_PAD), lambda i: (i, 0)),
        compiler_params=pltpu.CompilerParams(
            dimension_semantics=("parallel",),
            vmem_limit_bytes=32 * 1024 * 1024),
        cost_estimate=pl.CostEstimate(
            flops=flops,
            transcendentals=2 * b * OUT_PAD,   # sigmoid = exp + reciprocal
            bytes_accessed=bytes_accessed),
    )(x_flat, *packed_params)

    if return_padded:
        return out
    return out[:, :OUT_DIM].reshape(b, 10, 10)   # .view(-1, 10, 10)


def init_params(key):
    """Deterministic init matching PyTorch Linear shapes (weights transposed)."""
    def linear(key, fan_in, fan_out):
        kw, kb = jax.random.split(key)
        bound = 1.0 / jnp.sqrt(fan_in)
        w = jax.random.uniform(kw, (fan_in, fan_out), jnp.float32, -bound, bound)
        b = jax.random.uniform(kb, (fan_out,), jnp.float32, -bound, bound)
        return w, b

    k1, k2, k3, k4 = jax.random.split(key, 4)
    return (
        linear(k1, IN_DIM, HID),
        linear(k2, HID, HID),
        linear(k3, HID, HID),
        linear(k4, HID, OUT_DIM),
    )


def _reference_f32(x, params):
    """Plain-JAX f32 reference (matches the PyTorch module)."""
    b = x.shape[0]
    h = x.reshape(b, IN_DIM)
    (w1, b1), (w2, b2), (w3, b3), (w4, b4) = params
    h = jnp.maximum(h @ w1 + b1, 0.0)
    h = jnp.maximum(h @ w2 + b2, 0.0)
    h = jnp.maximum(h @ w3 + b3, 0.0)
    h = jax.nn.sigmoid(h @ w4 + b4)
    return h.reshape(b, 10, 10)


def _reference_bf16(x, params):
    """Reference emulating the kernel's bf16-matmul / f32-accumulate precision."""
    b = x.shape[0]
    h = x.reshape(b, IN_DIM).astype(jnp.bfloat16)
    (w1, b1), (w2, b2), (w3, b3), (w4, b4) = params
    h = jnp.dot(h, w1.astype(jnp.bfloat16), preferred_element_type=jnp.float32)
    h = jnp.maximum(h + b1, 0.0)
    h = jnp.dot(h.astype(jnp.bfloat16), w2.astype(jnp.bfloat16),
                preferred_element_type=jnp.float32)
    h = jnp.maximum(h + b2, 0.0)
    h = jnp.dot(h.astype(jnp.bfloat16), w3.astype(jnp.bfloat16),
                preferred_element_type=jnp.float32)
    h = jnp.maximum(h + b3, 0.0)
    h = jnp.dot(h.astype(jnp.bfloat16), w4.astype(jnp.bfloat16),
                preferred_element_type=jnp.float32)
    h = jax.nn.sigmoid(h + b4)
    return h.reshape(b, 10, 10)


if __name__ == "__main__":
    key = jax.random.PRNGKey(0)
    kx, kx2, kp = jax.random.split(key, 3)

    params = init_params(kp)
    packed = prepare_params(params)   # one-time weight packing (perf item 4)

    # Small-batch check (batch=2) — matches the module's expected input.
    batch = 2
    x = jax.random.normal(kx, (batch, 5, 10, 10), dtype=jnp.float32)
    out = jax.block_until_ready(fully_connected_nn(x, packed))
    assert out.shape == (batch, 10, 10)
    assert jnp.allclose(out, _reference_bf16(x, params), atol=1e-4, rtol=1e-4)
    assert jnp.allclose(out, _reference_f32(x, params), atol=2e-2, rtol=2e-2)

    # Larger batch to exercise the tiled / multi-step grid path.
    batch2 = 48
    x2 = jax.random.normal(kx2, (batch2, 5, 10, 10), dtype=jnp.float32)
    out2 = jax.block_until_ready(fully_connected_nn(x2, packed))
    assert out2.shape == (batch2, 10, 10)
    assert jnp.allclose(out2, _reference_bf16(x2, params), atol=1e-4, rtol=1e-4)
    assert jnp.allclose(out2, _reference_f32(x2, params), atol=2e-2, rtol=2e-2)

    print("KERNEL_OK")
</pallas_src>

<mosaic_0001>
module attributes {stable_mosaic.version = 11 : i64} {
  func.func @_mlp_kernel(%arg0: i32, %arg1: memref<2x500xf32, #tpu.memory_space<vmem>>, %arg2: memref<500x200xbf16, #tpu.memory_space<vmem>>, %arg3: memref<1x200xf32, #tpu.memory_space<vmem>>, %arg4: memref<200x200xbf16, #tpu.memory_space<vmem>>, %arg5: memref<1x200xf32, #tpu.memory_space<vmem>>, %arg6: memref<200x200xbf16, #tpu.memory_space<vmem>>, %arg7: memref<1x200xf32, #tpu.memory_space<vmem>>, %arg8: memref<200x128xbf16, #tpu.memory_space<vmem>>, %arg9: memref<1x128xf32, #tpu.memory_space<vmem>>, %arg10: memref<2x128xf32, #tpu.memory_space<vmem>>) attributes {dimension_semantics = [#tpu.dimension_semantics<parallel>], iteration_bounds = array<i64: 1>, scalar_prefetch = 0 : i64, scratch_operands = 0 : i64, tpu.core_type = #tpu.core_type<tc>, window_params = [{transform_indices = @transform_0, window_bounds = array<i64: 2, 500>}, {pipeline_mode = #tpu.pipeline_mode<synchronous>, transform_indices = @transform_1, window_bounds = array<i64: 500, 200>}, {pipeline_mode = #tpu.pipeline_mode<synchronous>, transform_indices = @transform_2, window_bounds = array<i64: 1, 200>}, {pipeline_mode = #tpu.pipeline_mode<synchronous>, transform_indices = @transform_3, window_bounds = array<i64: 200, 200>}, {pipeline_mode = #tpu.pipeline_mode<synchronous>, transform_indices = @transform_4, window_bounds = array<i64: 1, 200>}, {pipeline_mode = #tpu.pipeline_mode<synchronous>, transform_indices = @transform_5, window_bounds = array<i64: 200, 200>}, {pipeline_mode = #tpu.pipeline_mode<synchronous>, transform_indices = @transform_6, window_bounds = array<i64: 1, 200>}, {pipeline_mode = #tpu.pipeline_mode<synchronous>, transform_indices = @transform_7, window_bounds = array<i64: 200, 128>}, {pipeline_mode = #tpu.pipeline_mode<synchronous>, transform_indices = @transform_8, window_bounds = array<i64: 1, 128>}, {transform_indices = @transform_9, window_bounds = array<i64: 2, 128>}]} {
    %c0 = arith.constant 0 : index
    %c0_0 = arith.constant 0 : index
    %0 = vector.load %arg1[%c0, %c0_0] : memref<2x500xf32, #tpu.memory_space<vmem>>, vector<2x500xf32>
    %1 = arith.truncf %0 : vector<2x500xf32> to vector<2x500xbf16>
    %c0_1 = arith.constant 0 : index
    %c0_2 = arith.constant 0 : index
    %2 = vector.load %arg2[%c0_1, %c0_2] : memref<500x200xbf16, #tpu.memory_space<vmem>>, vector<500x200xbf16>
    %cst = arith.constant dense<0.000000e+00> : vector<2x200xf32>
    %3 = tpu.matmul %1, %2, %cst {dimension_numbers = #tpu.dot_dimension_numbers<[1], [0], [0], [1], [0, 0, 1, 1], [], []>} : vector<2x500xbf16>, vector<500x200xbf16>, vector<2x200xf32> -> vector<2x200xf32>
    %c0_3 = arith.constant 0 : index
    %c0_4 = arith.constant 0 : index
    %4 = vector.load %arg3[%c0_3, %c0_4] : memref<1x200xf32, #tpu.memory_space<vmem>>, vector<1x200xf32>
    %5 = vector.broadcast %4 : vector<1x200xf32> to vector<2x200xf32>
    %6 = arith.addf %3, %5 : vector<2x200xf32>
    %cst_5 = arith.constant 0.000000e+00 : f32
    %7 = vector.broadcast %cst_5 : f32 to vector<2x200xf32>
    %8 = arith.maximumf %6, %7 : vector<2x200xf32>
    %9 = arith.truncf %8 : vector<2x200xf32> to vector<2x200xbf16>
    %c0_6 = arith.constant 0 : index
    %c0_7 = arith.constant 0 : index
    %10 = vector.load %arg4[%c0_6, %c0_7] : memref<200x200xbf16, #tpu.memory_space<vmem>>, vector<200x200xbf16>
    %cst_8 = arith.constant dense<0.000000e+00> : vector<2x200xf32>
    %11 = tpu.matmul %9, %10, %cst_8 {dimension_numbers = #tpu.dot_dimension_numbers<[1], [0], [0], [1], [0, 0, 1, 1], [], []>} : vector<2x200xbf16>, vector<200x200xbf16>, vector<2x200xf32> -> vector<2x200xf32>
    %c0_9 = arith.constant 0 : index
    %c0_10 = arith.constant 0 : index
    %12 = vector.load %arg5[%c0_9, %c0_10] : memref<1x200xf32, #tpu.memory_space<vmem>>, vector<1x200xf32>
    %13 = vector.broadcast %12 : vector<1x200xf32> to vector<2x200xf32>
    %14 = arith.addf %11, %13 : vector<2x200xf32>
    %cst_11 = arith.constant 0.000000e+00 : f32
    %15 = vector.broadcast %cst_11 : f32 to vector<2x200xf32>
    %16 = arith.maximumf %14, %15 : vector<2x200xf32>
    %17 = arith.truncf %16 : vector<2x200xf32> to vector<2x200xbf16>
    %c0_12 = arith.constant 0 : index
    %c0_13 = arith.constant 0 : index
    %18 = vector.load %arg6[%c0_12, %c0_13] : memref<200x200xbf16, #tpu.memory_space<vmem>>, vector<200x200xbf16>
    %cst_14 = arith.constant dense<0.000000e+00> : vector<2x200xf32>
    %19 = tpu.matmul %17, %18, %cst_14 {dimension_numbers = #tpu.dot_dimension_numbers<[1], [0], [0], [1], [0, 0, 1, 1], [], []>} : vector<2x200xbf16>, vector<200x200xbf16>, vector<2x200xf32> -> vector<2x200xf32>
    %c0_15 = arith.constant 0 : index
    %c0_16 = arith.constant 0 : index
    %20 = vector.load %arg7[%c0_15, %c0_16] : memref<1x200xf32, #tpu.memory_space<vmem>>, vector<1x200xf32>
    %21 = vector.broadcast %20 : vector<1x200xf32> to vector<2x200xf32>
    %22 = arith.addf %19, %21 : vector<2x200xf32>
    %cst_17 = arith.constant 0.000000e+00 : f32
    %23 = vector.broadcast %cst_17 : f32 to vector<2x200xf32>
    %24 = arith.maximumf %22, %23 : vector<2x200xf32>
    %25 = arith.truncf %24 : vector<2x200xf32> to vector<2x200xbf16>
    %c0_18 = arith.constant 0 : index
    %c0_19 = arith.constant 0 : index
    %26 = vector.load %arg8[%c0_18, %c0_19] : memref<200x128xbf16, #tpu.memory_space<vmem>>, vector<200x128xbf16>
    %cst_20 = arith.constant dense<0.000000e+00> : vector<2x128xf32>
    %27 = tpu.matmul %25, %26, %cst_20 {dimension_numbers = #tpu.dot_dimension_numbers<[1], [0], [0], [1], [0, 0, 1, 1], [], []>} : vector<2x200xbf16>, vector<200x128xbf16>, vector<2x128xf32> -> vector<2x128xf32>
    %c0_21 = arith.constant 0 : index
    %c0_22 = arith.constant 0 : index
    %28 = vector.load %arg9[%c0_21, %c0_22] : memref<1x128xf32, #tpu.memory_space<vmem>>, vector<1x128xf32>
    %29 = vector.broadcast %28 : vector<1x128xf32> to vector<2x128xf32>
    %30 = arith.addf %27, %29 : vector<2x128xf32>
    %31 = arith.negf %30 : vector<2x128xf32>
    %32 = math.exp %31 : vector<2x128xf32>
    %cst_23 = arith.constant 1.000000e+00 : f32
    %33 = vector.broadcast %cst_23 : f32 to vector<2x128xf32>
    %34 = arith.addf %33, %32 : vector<2x128xf32>
    %35 = arith.divf %33, %34 : vector<2x128xf32>
    %c0_24 = arith.constant 0 : index
    %c0_25 = arith.constant 0 : index
    %36 = vector.load %arg10[%c0_24, %c0_25] : memref<2x128xf32, #tpu.memory_space<vmem>>, vector<2x128xf32>
    tpu.vector_store %arg10[%c0_24, %c0_25], %35 {strides = array<i32>} : memref<2x128xf32, #tpu.memory_space<vmem>>, vector<2x128xf32>,
    return
  }
  func.func @transform_0(%arg0: i32) -> (i32, i32) {
    %c0_i32 = arith.constant 0 : i32
    %c0_i32_0 = arith.constant 0 : i32
    return %arg0, %c0_i32 : i32, i32
  }
  func.func @transform_1(%arg0: i32) -> (i32, i32) {
    %c0_i32 = arith.constant 0 : i32
    %c0_i32_0 = arith.constant 0 : i32
    %c0_i32_1 = arith.constant 0 : i32
    return %c0_i32, %c0_i32_0 : i32, i32
  }
  func.func @transform_2(%arg0: i32) -> (i32, i32) {
    %c0_i32 = arith.constant 0 : i32
    %c0_i32_0 = arith.constant 0 : i32
    %c0_i32_1 = arith.constant 0 : i32
    return %c0_i32, %c0_i32_0 : i32, i32
  }
  func.func @transform_3(%arg0: i32) -> (i32, i32) {
    %c0_i32 = arith.constant 0 : i32
    %c0_i32_0 = arith.constant 0 : i32
    %c0_i32_1 = arith.constant 0 : i32
    return %c0_i32, %c0_i32_0 : i32, i32
  }
  func.func @transform_4(%arg0: i32) -> (i32, i32) {
    %c0_i32 = arith.constant 0 : i32
    %c0_i32_0 = arith.constant 0 : i32
    %c0_i32_1 = arith.constant 0 : i32
    return %c0_i32, %c0_i32_0 : i32, i32
  }
  func.func @transform_5(%arg0: i32) -> (i32, i32) {
    %c0_i32 = arith.constant 0 : i32
    %c0_i32_0 = arith.constant 0 : i32
    %c0_i32_1 = arith.constant 0 : i32
    return %c0_i32, %c0_i32_0 : i32, i32
  }
  func.func @transform_6(%arg0: i32) -> (i32, i32) {
    %c0_i32 = arith.constant 0 : i32
    %c0_i32_0 = arith.constant 0 : i32
    %c0_i32_1 = arith.constant 0 : i32
    return %c0_i32, %c0_i32_0 : i32, i32
  }
  func.func @transform_7(%arg0: i32) -> (i32, i32) {
    %c0_i32 = arith.constant 0 : i32
    %c0_i32_0 = arith.constant 0 : i32
    %c0_i32_1 = arith.constant 0 : i32
    return %c0_i32, %c0_i32_0 : i32, i32
  }
  func.func @transform_8(%arg0: i32) -> (i32, i32) {
    %c0_i32 = arith.constant 0 : i32
    %c0_i32_0 = arith.constant 0 : i32
    %c0_i32_1 = arith.constant 0 : i32
    return %c0_i32, %c0_i32_0 : i32, i32
  }
  func.func @transform_9(%arg0: i32) -> (i32, i32) {
    %c0_i32 = arith.constant 0 : i32
    %c0_i32_0 = arith.constant 0 : i32
    return %arg0, %c0_i32 : i32, i32
  }
}

</mosaic_0001>

<bundles_post_ra>
// kernel: tpu_custom_call.1
= control target key start
LH: loop header
LB: loop body
LE: loop exit
PB: predicated region body
PF: predicated region fallthrough
CT: control target
= control target key end

     0   :  { %vm455_vm0 = vcmask 1041408   ;;  %v1508_v36 = vmov 1983009808   ;;  %v40_v38 = vlaneseq  ;;  %vm451_vm1 = vcmask 949248   ;;  %s1980_s0 = inlined_call_operand.vmem [shape: f32[2,500], index: 0, kind: input, shape index: {}]   ;;  %s1981_s1 = inlined_call_operand.vmem [shape: bf16[500,200], index: 1, kind: input, shape index: {}]   ;;  %s1982_s2 = inlined_call_operand.vmem [shape: f32[1,200], index: 2, kind: input, shape index: {}]   ;;  %s1983_s3 = inlined_call_operand.vmem [shape: bf16[200,200], index: 3, kind: input, shape index: {}]   ;;  %s1984_s4 = inlined_call_operand.vmem [shape: f32[1,200], index: 4, kind: input, shape index: {}]   ;;  %s1985_s5 = inlined_call_operand.vmem [shape: bf16[200,200], index: 5, kind: input, shape index: {}]   ;;  %s1986_s6 = inlined_call_operand.vmem [shape: f32[1,200], index: 6, kind: input, shape index: {}]   ;;  %s1987_s7 = inlined_call_operand.vmem [shape: bf16[200,128], index: 7, kind: input, shape index: {}]   ;;  %s1988_s8 = inlined_call_operand.vmem [shape: f32[1,128], index: 8, kind: input, shape index: {}]   ;;  %s1989_s9 = inlined_call_operand.hbm [shape: f32[2,128], index: 9, kind: output, shape index: {}]  }
   0x1   :  { %v1297_v0 = vld [vmem:[%s1981_s1 + $0x74] ss:$8 sps:$4 sm:$0xff]   ;;  %v1301_v2 = vld [vmem:[%s1981_s1 + $0x70] ss:$8 sps:$4 sm:$0xff]   ;;  %v1303_v4 = vld [vmem:[%s1981_s1 + $0x64] ss:$8 sps:$4 sm:$0xff]   ;;  %v38_v37 = vunpack.c.l.s4 %v1508_v36 }
   0x2   :  { %v1299_v1 = vld [vmem:[%s1981_s1 + $0x174] ss:$8 sps:$4 sm:$0xff]   ;;  %462 = vmatprep.subr.bf16.mxu0 %v1297_v0  ;;  %v1302_v3 = vld [vmem:[%s1981_s1 + $0x170] ss:$8 sps:$4 sm:$0xff]   ;;  %v1305_v5 = vld [vmem:[%s1981_s1 + $0x164] ss:$8 sps:$4 sm:$0xff]  }
   0x3   :  { %503 = vmatprep.subr.bf16.mxu1 %v1299_v1  ;;  %463 = vmatpush1.bf16.msra.mxu0 %v1301_v2  ;;  %v1307_v6 = vld [vmem:[%s1981_s1 + $0x60] ss:$8 sps:$4 sm:$0xff]   ;;  %v1309_v8 = vld [vmem:[%s1981_s1 + $0x54] ss:$8 sps:$4 sm:$0xff]   ;;  %v1313_v10 = vld [vmem:[%s1981_s1 + $0x50] ss:$8 sps:$4 sm:$0xff]   ;;  %v39_v43 = vunpack.c.0.s8 %v38_v37 }
   0x4   :  { %504 = vmatpush1.bf16.msra.mxu1 %v1302_v3  ;;  %464 = vmatprep.subr.bf16.mxu0 %v1303_v4  ;;  %v1308_v7 = vld [vmem:[%s1981_s1 + $0x160] ss:$8 sps:$4 sm:$0xff]   ;;  %v1311_v9 = vld [vmem:[%s1981_s1 + $0x154] ss:$8 sps:$4 sm:$0xff]   ;;  %v1314_v11 = vld [vmem:[%s1981_s1 + $0x150] ss:$8 sps:$4 sm:$0xff]  }
   0x5   :  { %505 = vmatprep.subr.bf16.mxu1 %v1305_v5  ;;  %v1315_v12 = vld [vmem:[%s1981_s1 + $0x44] ss:$8 sps:$4 sm:$0xff]   ;;  %v1319_v14 = vld [vmem:[%s1981_s1 + $0x40] ss:$8 sps:$4 sm:$0xff]   ;;  %v1321_v16 = vld [vmem:[%s1981_s1 + $0x34] ss:$8 sps:$4 sm:$0xff]  }
   0x6   :  { %v1317_v13 = vld [vmem:[%s1981_s1 + $0x144] ss:$8 sps:$4 sm:$0xff]   ;;  %v1320_v15 = vld [vmem:[%s1981_s1 + $0x140] ss:$8 sps:$4 sm:$0xff]   ;;  %v1323_v17 = vld [vmem:[%s1981_s1 + $0x134] ss:$8 sps:$4 sm:$0xff]  }
   0x7   :  { %465 = vmatpush1.bf16.msra.mxu0 %v1307_v6  ;;  %v1325_v18 = vld [vmem:[%s1981_s1 + $0x30] ss:$8 sps:$4 sm:$0xff]   ;;  %v1327_v20 = vld [vmem:[%s1981_s1 + $0x24] ss:$8 sps:$4 sm:$0xff]   ;;  %v1331_v22 = vld [vmem:[%s1981_s1 + $0x20] ss:$8 sps:$4 sm:$0xff]  }
   0x8   :  { %506 = vmatpush1.bf16.msra.mxu1 %v1308_v7  ;;  %466 = vmatprep.subr.bf16.mxu0 %v1309_v8  ;;  %v1326_v19 = vld [vmem:[%s1981_s1 + $0x130] ss:$8 sps:$4 sm:$0xff]   ;;  %v1329_v21 = vld [vmem:[%s1981_s1 + $0x124] ss:$8 sps:$4 sm:$0xff]   ;;  %v1332_v23 = vld [vmem:[%s1981_s1 + $0x120] ss:$8 sps:$4 sm:$0xff]  }
   0x9   :  { %507 = vmatprep.subr.bf16.mxu1 %v1311_v9  ;;  %v1333_v24 = vld [vmem:[%s1981_s1 + $0x14] ss:$8 sps:$4 sm:$0xff]   ;;  %v1337_v26 = vld [vmem:[%s1981_s1 + $0x10] ss:$8 sps:$4 sm:$0xff]   ;;  %v1339_v28 = vld [vmem:[%s1981_s1 + $0x4] ss:$8 sps:$4 sm:$0xff]  }
   0xa   :  { %v1335_v25 = vld [vmem:[%s1981_s1 + $0x114] ss:$8 sps:$4 sm:$0xff]   ;;  %v1338_v27 = vld [vmem:[%s1981_s1 + $0x110] ss:$8 sps:$4 sm:$0xff]   ;;  %v1341_v29 = vld [vmem:[%s1981_s1 + $0x104] ss:$8 sps:$4 sm:$0xff]  }
   0xb   :  { %467 = vmatpush1.bf16.msra.mxu0 %v1313_v10  ;;  %v123_v30 = vld [vmem:[%s1981_s1 + $0x1f0] sm:$0x33]  ;;  %v1343_v31 = vld [vmem:[%s1981_s1] ss:$8 sps:$4 sm:$0xff]   ;;  %v1350_v41 = vld [vmem:[%s1981_s1 + $0xe4] ss:$8 sps:$4 sm:$0xff]  }
   0xc   :  { %508 = vmatpush1.bf16.msra.mxu1 %v1314_v11  ;;  %468 = vmatprep.subr.bf16.mxu0 %v1315_v12  ;;  %v1344_v32 = vld [vmem:[%s1981_s1 + $0x100] ss:$8 sps:$4 sm:$0xff]   ;;  %v1345_v33 = vld [vmem:[%s1981_s1 + $0xf4] ss:$8 sps:$4 sm:$0xff]   ;;  %v1219_v34 = vcombine.high %v123_v30, %v123_v30  ;;  %v1218_v35 = vcombine.low %v123_v30, %v123_v30  ;;  %v1348_v39 = vld [vmem:[%s1981_s1 + $0xf0] ss:$8 sps:$4 sm:$0xff]  }
   0xd   :  { %509 = vmatprep.subr.bf16.mxu1 %v1317_v13  ;;  %v1352_v42 = vld [vmem:[%s1981_s1 + $0x1e4] ss:$8 sps:$4 sm:$0xff]   ;;  %v1672_v44 = vshrl.u32 %v40_v38, 7  ;;  %v1354_v45 = vld [vmem:[%s1981_s1 + $0xe0] ss:$8 sps:$4 sm:$0xff]  }
   0xe   :  { %v457_v40 = vsel %vm455_vm0, %v1218_v35, 0  ;;  %v1355_v46 = vld [vmem:[%s1981_s1 + $0x1e0] ss:$8 sps:$4 sm:$0xff]   ;;  %v1356_v47 = vld [vmem:[%s1981_s1 + $0xd4] ss:$8 sps:$4 sm:$0xff]  }
   0xf   :  { %469 = vmatpush1.bf16.msra.mxu0 %v1319_v14  ;;  %v1358_v48 = vld [vmem:[%s1981_s1 + $0x1d4] ss:$8 sps:$4 sm:$0xff]   ;;  %v42_v49 = vsub.s32 %v39_v43, %v1672_v44  ;;  %v1360_v50 = vld [vmem:[%s1981_s1 + $0xd0] ss:$8 sps:$4 sm:$0xff]   ;;  %v1362_v52 = vld [vmem:[%s1981_s1 + $0xc4] ss:$8 sps:$4 sm:$0xff]  }
  0x10   :  { %510 = vmatpush1.bf16.msra.mxu1 %v1320_v15  ;;  %470 = vmatprep.subr.bf16.mxu0 %v1321_v16  ;;  %v1361_v51 = vld [vmem:[%s1981_s1 + $0x1d0] ss:$8 sps:$4 sm:$0xff]   ;;  %v1364_v53 = vld [vmem:[%s1981_s1 + $0x1c4] ss:$8 sps:$4 sm:$0xff]   ;;  %v1366_v57 = vld [vmem:[%s1981_s1 + $0xc0] ss:$8 sps:$4 sm:$0xff]  }
  0x11   :  { %511 = vmatprep.subr.bf16.mxu1 %v1323_v17  ;;  %v34_v54 = vld [vmem:[%s1980_s0] sm:$0xff]  ;;  %v1368_v61 = vld [vmem:[%s1981_s1 + $0xb4] ss:$8 sps:$4 sm:$0xff]   ;;  %v1372_v1 = vld [vmem:[%s1981_s1 + $0xb0] ss:$8 sps:$4 sm:$0xff]  }
  0x12   :  { %v36_v55 = vcombine.high %v34_v54, %v34_v54  ;;  %v43_v56 = vrot.slane %v34_v54, %v42_v49  ;;  %v1367_v58 = vld [vmem:[%s1981_s1 + $0x1c0] ss:$8 sps:$4 sm:$0xff]   ;;  %v1370_v62 = vld [vmem:[%s1981_s1 + $0x1b4] ss:$8 sps:$4 sm:$0xff]   ;;  %v1373_v2 = vld [vmem:[%s1981_s1 + $0x1b0] ss:$8 sps:$4 sm:$0xff]  }
  0x13   :  { %471 = vmatpush1.bf16.msra.mxu0 %v1325_v18  ;;  %v1374_v4 = vld [vmem:[%s1981_s1 + $0xa4] ss:$8 sps:$4 sm:$0xff]   ;;  %v1378_v6 = vld [vmem:[%s1981_s1 + $0xa0] ss:$8 sps:$4 sm:$0xff]   ;;  %v1380_v8 = vld [vmem:[%s1981_s1 + $0x94] ss:$8 sps:$4 sm:$0xff]  }
  0x14   :  { %512 = vmatpush1.bf16.msra.mxu1 %v1326_v19  ;;  %472 = vmatprep.subr.bf16.mxu0 %v1327_v20  ;;  %v51_v59 = vcombine.high %v43_v56, %v43_v56  ;;  %v50_v60 = vrot.slane %v36_v55, %v42_v49  ;;  %v1376_v5 = vld [vmem:[%s1981_s1 + $0x1a4] ss:$8 sps:$4 sm:$0xff]   ;;  %v1379_v7 = vld [vmem:[%s1981_s1 + $0x1a0] ss:$8 sps:$4 sm:$0xff]   ;;  %v1382_v9 = vld [vmem:[%s1981_s1 + $0x194] ss:$8 sps:$4 sm:$0xff]   ;;  %v57_v18 = vpack.c.bf16 %v43_v56, %v43_v56 }
  0x15   :  { %513 = vmatprep.subr.bf16.mxu1 %v1329_v21  ;;  %v1384_v10 = vld [vmem:[%s1981_s1 + $0x90] ss:$8 sps:$4 sm:$0xff]   ;;  %v1386_v12 = vld [vmem:[%s1981_s1 + $0x84] ss:$8 sps:$4 sm:$0xff]   ;;  %v1390_v14 = vld [vmem:[%s1981_s1 + $0x80] ss:$8 sps:$4 sm:$0xff]  }
  0x16   :  { %v58_v63 = vpack.c.bf16 %v51_v59, %v51_v59  ;;  %v52_v0 = vcombine.high %v50_v60, %v50_v60  ;;  %v1385_v11 = vld [vmem:[%s1981_s1 + $0x190] ss:$8 sps:$4 sm:$0xff]   ;;  %v1388_v13 = vld [vmem:[%s1981_s1 + $0x184] ss:$8 sps:$4 sm:$0xff]   ;;  %v1391_v15 = vld [vmem:[%s1981_s1 + $0x180] ss:$8 sps:$4 sm:$0xff]   ;;  %v59_v19 = vpack.c.bf16 %v50_v60, %v50_v60 }
  0x17   :  { %473 = vmatpush1.bf16.msra.mxu0 %v1331_v22  ;;  %v1395_v16 = vld [vmem:[%s1983_s3 + $0x74] ss:$8 sps:$4 sm:$0xff]   ;;  %v1393_v17 = vld [vmem:[%s1983_s3 + $0x70] ss:$8 sps:$4 sm:$0xff]   ;;  %v1398_v20 = vld [vmem:[%s1983_s3 + $0x64] ss:$8 sps:$4 sm:$0xff]  }
  0x18   :  { %514 = vmatpush1.bf16.msra.mxu1 %v1332_v23  ;;  %474 = vmatprep.subr.bf16.mxu0 %v1333_v24  ;;  %v60_v3 = vpack.c.bf16 %v52_v0, %v52_v0  ;;  %v1396_v21 = vld [vmem:[%s1983_s3 + $0x60] ss:$8 sps:$4 sm:$0xff]   ;;  %v1401_v22 = vld [vmem:[%s1983_s3 + $0x54] ss:$8 sps:$4 sm:$0xff]   ;;  %v1399_v23 = vld [vmem:[%s1983_s3 + $0x50] ss:$8 sps:$4 sm:$0xff]  }
  0x19   :  { %515 = vmatprep.subr.bf16.mxu1 %v1335_v25  ;;  %494 = vmatprep.mubr.bf16.mxu0 %v58_v63  ;;  %v1404_v24 = vld [vmem:[%s1983_s3 + $0x44] ss:$8 sps:$4 sm:$0xff]  }
  0x1a   :  { %1221 = vmatprep.mubr.msk.bf16.mxu1 %vm451_vm1, %v60_v3 }
  0x1b   :  { %475 = vmatpush1.bf16.msra.mxu0 %v1337_v26 }
  0x1c   :  { %516 = vmatpush1.bf16.msra.mxu1 %v1338_v27  ;;  %476 = vmatprep.subr.bf16.mxu0 %v1339_v28 }
  0x1d   :  { %517 = vmatprep.subr.bf16.mxu1 %v1341_v29 }
  0x1f   :  { %477 = vmatpush1.bf16.msra.mxu0 %v1343_v31 }
  0x20   :  { %518 = vmatpush1.bf16.msra.mxu1 %v1344_v32  ;;  %478 = vmatprep.subr.bf16.mxu0 %v1345_v33 }
  0x21   :  { %1220 = vmatprep.subr.msk.bf16.mxu1 %vm455_vm0, %v1219_v34 }
  0x23   :  { %479 = vmatpush2.bf16.msra.mxu0 %v1348_v39 }
  0x24   :  { %520 = vmatpush2.bf16.msra.mxu1 %v457_v40  ;;  %480 = vmatprep.subr.bf16.mxu0 %v1350_v41 }
  0x25   :  { %521 = vmatprep.subr.bf16.mxu1 %v1352_v42 }
  0x27   :  { %481 = vmatpush2.bf16.msra.mxu0 %v1354_v45 }
  0x28   :  { %522 = vmatpush2.bf16.msra.mxu1 %v1355_v46  ;;  %482 = vmatprep.subr.bf16.mxu0 %v1356_v47 }
  0x29   :  { %523 = vmatprep.subr.bf16.mxu1 %v1358_v48 }
  0x2b   :  { %483 = vmatpush2.bf16.msra.mxu0 %v1360_v50 }
  0x2c   :  { %524 = vmatpush2.bf16.msra.mxu1 %v1361_v51  ;;  %484 = vmatprep.subr.bf16.mxu0 %v1362_v52 }
  0x2d   :  { %525 = vmatprep.subr.bf16.mxu1 %v1364_v53 }
  0x2f   :  { %485 = vmatpush2.bf16.msra.mxu0 %v1366_v57 }
  0x30   :  { %526 = vmatpush2.bf16.msra.mxu1 %v1367_v58  ;;  %486 = vmatprep.subr.bf16.mxu0 %v1368_v61 }
  0x31   :  { %527 = vmatprep.subr.bf16.mxu1 %v1370_v62 }
  0x33   :  { %487 = vmatpush2.bf16.msra.mxu0 %v1372_v1 }
  0x34   :  { %528 = vmatpush2.bf16.msra.mxu1 %v1373_v2  ;;  %488 = vmatprep.subr.bf16.mxu0 %v1374_v4 }
  0x35   :  { %529 = vmatprep.subr.bf16.mxu1 %v1376_v5 }
  0x37   :  { %489 = vmatpush2.bf16.msra.mxu0 %v1378_v6 }
  0x38   :  { %530 = vmatpush2.bf16.msra.mxu1 %v1379_v7  ;;  %490 = vmatprep.subr.bf16.mxu0 %v1380_v8 }
  0x39   :  { %531 = vmatprep.subr.bf16.mxu1 %v1382_v9 }
  0x3b   :  { %491 = vmatpush2.bf16.msra.mxu0 %v1384_v10 }
  0x3c   :  { %532 = vmatpush2.bf16.msra.mxu1 %v1385_v11  ;;  %492 = vmatprep.subr.bf16.mxu0 %v1386_v12 }
  0x3d   :  { %533 = vmatprep.subr.bf16.mxu1 %v1388_v13 }
  0x3f   :  { %493 = vmatpush2.bf16.msra.mxu0 %v1390_v14 }
  0x40   :  { %534 = vmatpush2.bf16.msra.mxu1 %v1391_v15  ;;  %721 = vmatprep.subr.bf16.mxu0 %v1395_v16 }
  0x42   :  { %495 = vmatmul.mubr.bf16.vlgmr.msra.gmra.mxu0 %v57_v18 }
  0x43   :  { %536 = vmatmul.mubr.bf16.vlgmr.msra.gmra.mxu1 %v59_v19  ;;  %722 = vmatpush1.bf16.msra.mxu0 %v1393_v17 }
  0x44   :  { %723 = vmatprep.subr.bf16.mxu0 %v1398_v20 }
  0x47   :  { %724 = vmatpush1.bf16.msra.mxu0 %v1396_v21 }
  0x48   :  { %725 = vmatprep.subr.bf16.mxu0 %v1401_v22 }
  0x49   :  { %14 = vsyncpa [#allocation3], 0  ;;  %v1402_v25 = vld [vmem:[%s1983_s3 + $0x40] ss:$8 sps:$4 sm:$0xff]   ;;  %v1407_v26 = vld [vmem:[%s1983_s3 + $0x34] ss:$8 sps:$4 sm:$0xff]  }
  0x4a   :  { %v1405_v27 = vld [vmem:[%s1983_s3 + $0x30] ss:$8 sps:$4 sm:$0xff]   ;;  %v1410_v28 = vld [vmem:[%s1983_s3 + $0x24] ss:$8 sps:$4 sm:$0xff]   ;;  %v1408_v29 = vld [vmem:[%s1983_s3 + $0x20] ss:$8 sps:$4 sm:$0xff]  }
  0x4b   :  { %726 = vmatpush1.bf16.msra.mxu0 %v1399_v23  ;;  %v1413_v30 = vld [vmem:[%s1983_s3 + $0x14] ss:$8 sps:$4 sm:$0xff]   ;;  %v1411_v31 = vld [vmem:[%s1983_s3 + $0x10] ss:$8 sps:$4 sm:$0xff]   ;;  %v1416_v32 = vld [vmem:[%s1983_s3 + $0x4] ss:$8 sps:$4 sm:$0xff]  }
  0x4c   :  { %727 = vmatprep.subr.bf16.mxu0 %v1404_v24  ;;  %v572_v33 = vld [vmem:[%s1983_s3 + $0xc0] sm:$0xff]  ;;  %vm714_vm2 = vcmask 1043456   ;;  %v1421_v38 = vld [vmem:[%s1983_s3 + $0xb4] ss:$8 sps:$4 sm:$0xff]   ;;  %v1419_v39 = vld [vmem:[%s1983_s3 + $0xb0] ss:$8 sps:$4 sm:$0xff]  }
  0x4d   :  { %v1414_v34 = vld [vmem:[%s1983_s3] ss:$8 sps:$4 sm:$0xff]   ;;  %v1247_v35 = vcombine.high %v572_v33, %v572_v33  ;;  %v1246_v36 = vcombine.low %v572_v33, %v572_v33  ;;  %v1424_v40 = vld [vmem:[%s1983_s3 + $0xa4] ss:$8 sps:$4 sm:$0xff]   ;;  %v1427_v42 = vld [vmem:[%s1983_s3 + $0x94] ss:$8 sps:$4 sm:$0xff]  }
  0x4e   :  { %v1422_v41 = vld [vmem:[%s1983_s3 + $0xa0] ss:$8 sps:$4 sm:$0xff]   ;;  %v1425_v43 = vld [vmem:[%s1983_s3 + $0x90] ss:$8 sps:$4 sm:$0xff]   ;;  %v1430_v45 = vld [vmem:[%s1983_s3 + $0x84] ss:$8 sps:$4 sm:$0xff]  }
  0x4f   :  { %728 = vmatpush1.bf16.msra.mxu0 %v1402_v25  ;;  %v716_v37 = vsel %vm714_vm2, %v1246_v36, 0  ;;  %v1428_v46 = vld [vmem:[%s1983_s3 + $0x80] ss:$8 sps:$4 sm:$0xff]   ;;  %v1431_v47 = vld [vmem:[%s1985_s5 + $0x70] ss:$8 sps:$4 sm:$0xff]   ;;  %v1899_v7 = vsub.s32 0, %v1672_v44 }
  0x50   :  { %729 = vmatprep.subr.bf16.mxu0 %v1407_v26  ;;  %v1433_v48 = vld [vmem:[%s1985_s5 + $0x74] ss:$8 sps:$4 sm:$0xff]   ;;  %v1436_v49 = vld [vmem:[%s1985_s5 + $0x64] ss:$8 sps:$4 sm:$0xff]   ;;  %v1434_v50 = vld [vmem:[%s1985_s5 + $0x60] ss:$8 sps:$4 sm:$0xff]  }
  0x51   :  { %937 = vmatprep.subr.bf16.mxu1 %v1433_v48  ;;  %v1439_v51 = vld [vmem:[%s1985_s5 + $0x54] ss:$8 sps:$4 sm:$0xff]   ;;  %v1437_v52 = vld [vmem:[%s1985_s5 + $0x50] ss:$8 sps:$4 sm:$0xff]   ;;  %v1442_v53 = vld [vmem:[%s1985_s5 + $0x44] ss:$8 sps:$4 sm:$0xff]  }
  0x52   :  { %938 = vmatpush1.bf16.msra.mxu1 %v1431_v47  ;;  %v1440_v54 = vld [vmem:[%s1985_s5 + $0x40] ss:$8 sps:$4 sm:$0xff]   ;;  %v1445_v55 = vld [vmem:[%s1985_s5 + $0x34] ss:$8 sps:$4 sm:$0xff]   ;;  %v1443_v56 = vld [vmem:[%s1985_s5 + $0x30] ss:$8 sps:$4 sm:$0xff]  }
  0x53   :  { %730 = vmatpush1.bf16.msra.mxu0 %v1405_v27  ;;  %939 = vmatprep.subr.bf16.mxu1 %v1436_v49  ;;  %v1448_v57 = vld [vmem:[%s1985_s5 + $0x24] ss:$8 sps:$4 sm:$0xff]   ;;  %v1446_v58 = vld [vmem:[%s1985_s5 + $0x20] ss:$8 sps:$4 sm:$0xff]   ;;  %v1451_v59 = vld [vmem:[%s1985_s5 + $0x14] ss:$8 sps:$4 sm:$0xff]  }
  0x54   :  { %731 = vmatprep.subr.bf16.mxu0 %v1410_v28  ;;  %v1449_v60 = vld [vmem:[%s1985_s5 + $0x10] ss:$8 sps:$4 sm:$0xff]   ;;  %v1454_v61 = vld [vmem:[%s1985_s5 + $0x4] ss:$8 sps:$4 sm:$0xff]   ;;  %v1452_v63 = vld [vmem:[%s1985_s5] ss:$8 sps:$4 sm:$0xff]  }
  0x55   :  { %v790_v62 = vld [vmem:[%s1985_s5 + $0xc0] sm:$0xff]  ;;  %v1459_v3 = vld [vmem:[%s1985_s5 + $0xb4] ss:$8 sps:$4 sm:$0xff]   ;;  %v1457_v4 = vld [vmem:[%s1985_s5 + $0xb0] ss:$8 sps:$4 sm:$0xff]   ;;  %v1905_v9 = vsub.s32 1, %v1672_v44 }
  0x56   :  { %940 = vmatpush1.bf16.msra.mxu1 %v1434_v50  ;;  %v1275_v0 = vcombine.high %v790_v62, %v790_v62  ;;  %v1274_v1 = vcombine.low %v790_v62, %v790_v62  ;;  %v1462_v5 = vld [vmem:[%s1985_s5 + $0xa4] ss:$8 sps:$4 sm:$0xff]   ;;  %v1460_v6 = vld [vmem:[%s1985_s5 + $0xa0] ss:$8 sps:$4 sm:$0xff]   ;;  %vm710_vm3 = vcmask 588800   ;;  %v1470_v33 = vld [vmem:[%s1987_s7 + $0x30] sm:$0xff]  }
  0x57   :  { %732 = vmatpush1.bf16.msra.mxu0 %v1408_v29  ;;  %941 = vmatprep.subr.bf16.mxu1 %v1439_v51  ;;  %v124_v8 = vld [vmem:[%s1982_s2] sm:$0x3]  ;;  %v1465_v27 = vld [vmem:[%s1985_s5 + $0x94] ss:$8 sps:$4 sm:$0xff]   ;;  %v1463_v28 = vld [vmem:[%s1985_s5 + $0x90] ss:$8 sps:$4 sm:$0xff]  }
  0x58   :  { %733 = vmatprep.subr.bf16.mxu0 %v1413_v30  ;;  %v932_v2 = vsel %vm714_vm2, %v1274_v1, 0  ;;  %v129_v10 = vrot.slane %v124_v8, %v1899_v7  ;;  %v133_v11 = vrot.slane %v124_v8, %v1905_v9  ;;  %v1468_v29 = vld [vmem:[%s1985_s5 + $0x84] ss:$8 sps:$4 sm:$0xff]   ;;  %v1466_v30 = vld [vmem:[%s1985_s5 + $0x80] ss:$8 sps:$4 sm:$0xff]   ;;  %v1473_v36 = vld [vmem:[%s1987_s7 + $0x18] sm:$0xff]  }
  0x5a   :  { %942 = vmatpush1.bf16.msra.mxu1 %v1437_v52 }
  0x5b   :  { %734 = vmatpush1.bf16.msra.mxu0 %v1411_v31  ;;  %943 = vmatprep.subr.bf16.mxu1 %v1442_v53  ;;  %v1469_v31 = vld [vmem:[%s1987_s7 + $0x38] sm:$0xff]  }
  0x5c   :  { %735 = vmatprep.subr.bf16.mxu0 %v1416_v32  ;;  %v1509_v32 = vmov 0  }
  0x5e   :  { %944 = vmatpush1.bf16.msra.mxu1 %v1440_v54 }
  0x5f   :  { %736 = vmatpush1.bf16.msra.mxu0 %v1414_v34  ;;  %945 = vmatprep.subr.bf16.mxu1 %v1445_v55  ;;  %v1471_v34 = vld [vmem:[%s1987_s7 + $0x28] sm:$0xff]  }
  0x60   :  { %1248 = vmatprep.subr.msk.bf16.mxu0 %vm714_vm2, %v1247_v35  ;;  %v1472_v35 = vld [vmem:[%s1987_s7 + $0x20] sm:$0xff]  }
  0x62   :  { %946 = vmatpush1.bf16.msra.mxu1 %v1443_v56 }
  0x63   :  { %744 = vmatpush2.bf16.msra.mxu0 %v716_v37  ;;  %947 = vmatprep.subr.bf16.mxu1 %v1448_v57  ;;  %v1474_v37 = vld [vmem:[%s1987_s7 + $0x10] sm:$0xff]  }
  0x64   :  { %745 = vmatprep.subr.bf16.mxu0 %v1421_v38  ;;  %v1475_v38 = vld [vmem:[%s1987_s7 + $0x8] sm:$0xff]  }
  0x66   :  { %948 = vmatpush1.bf16.msra.mxu1 %v1446_v58  ;;  %v1480_v58 = vld [vmem:[%s1987_s7 + $0x48] sm:$0xff]  }
  0x67   :  { %746 = vmatpush2.bf16.msra.mxu0 %v1419_v39  ;;  %949 = vmatprep.subr.bf16.mxu1 %v1451_v59  ;;  %v1476_v39 = vld [vmem:[%s1987_s7] sm:$0xff]  }
  0x68   :  { %747 = vmatprep.subr.bf16.mxu0 %v1424_v40  ;;  %v1477_v40 = vld [vmem:[%s1987_s7 + $0x60] ss:$0 sps:$4 sm:$0xff]  }
  0x69   :  { %v1481_v59 = vld [vmem:[%s1987_s7 + $0x40] sm:$0xff]  }
  0x6a   :  { %950 = vmatpush1.bf16.msra.mxu1 %v1449_v60  ;;  %v791_v60 = vld [vmem:[%s1986_s6] sm:$0x3]  ;;  %s1510_s6 = smov [#allocation2]  }
  0x6b   :  { %748 = vmatpush2.bf16.msra.mxu0 %v1422_v41  ;;  %951 = vmatprep.subr.bf16.mxu1 %v1454_v61  ;;  %v1093_v41 = vsel %vm714_vm2, %v1477_v40, 0  ;;  %v796_v61 = vrot.slane %v791_v60, %v1899_v7  ;;  %v800_v62 = vrot.slane %v791_v60, %v1905_v9  ;;  %s1148_s19 = sshll.u32 %s1510_s6, 4  ;;  %s1149_s19 = int_to_ptr.vmem [resolvable:$true] %s1148_s19 }
  0x6c   :  { %749 = vmatprep.subr.bf16.mxu0 %v1427_v42  ;;  %v1478_v42 = vld [vmem:[%s1987_s7 + $0x58] sm:$0xff]   ;;  %s1486_s3 = scalar_lea.vmem %s1149_s19, 32  ;;  %p1491_p1 = scmp.lt.s32.totalorder %s1149_s19, %s1149_s19 }
  0x6d   :  { %p1487_p0 = scmp.ne.s32.totalorder %s1149_s19, %s1486_s3  ;;  %p1492_p2 = scmp.lt.s32.totalorder %s1486_s3, %s1486_s3 }
  0x6e   :  { %952 = vmatpush1.bf16.msra.mxu1 %v1452_v63 }
  0x6f   :  { %750 = vmatpush2.bf16.msra.mxu0 %v1425_v43  ;;  %1276 = vmatprep.subr.msk.bf16.mxu1 %vm714_vm2, %v1275_v0  ;;  %v1479_v43 = vld [vmem:[%s1987_s7 + $0x50] sm:$0xff]   ;;  %p1493_p3 = por %p1492_p2, %p1491_p1 }
  0x70   :  { %751 = vmatprep.subr.bf16.mxu0 %v1430_v45  ;;  %v573_v45 = vld [vmem:[%s1984_s4] sm:$0x3] }
  0x71   :  { %v582_v47 = vrot.slane %v573_v45, %v1905_v9  ;;  %p1494_p4 = pnand %p1493_p3, %p1487_p0 }
  0x72   :  { %960 = vmatpush2.bf16.msra.mxu1 %v932_v2 }
  0x73   :  { %752 = vmatpush2.bf16.msra.mxu0 %v1428_v46  ;;  %961 = vmatprep.subr.bf16.mxu1 %v1459_v3  ;;  %v578_v46 = vrot.slane %v573_v45, %v1899_v7 }
  0x74   :  { %1095 = vmatprep.subr.bf16.mxu0 %v1509_v32 }
  0x76   :  { %962 = vmatpush2.bf16.msra.mxu1 %v1457_v4 }
  0x77   :  { %963 = vmatprep.subr.bf16.mxu1 %v1462_v5 }
  0x7a   :  { %964 = vmatpush2.bf16.msra.mxu1 %v1460_v6 }
  0x7b   :  { %965 = vmatprep.subr.bf16.mxu1 %v1465_v27 }
  0x7e   :  { %966 = vmatpush2.bf16.msra.mxu1 %v1463_v28 }
  0x7f   :  { %967 = vmatprep.subr.bf16.mxu1 %v1468_v29 }
  0x82   :  { %968 = vmatpush2.bf16.msra.mxu1 %v1466_v30 }
 0x102   :  { %v496_v12 = vpop.f32.mrf.mxu0 }
 0x103   :  { %v537_v13 = vpop.f32.mrf.mxu1  ;;  %v497_v14 = vadd.f32 %v496_v12, %v129_v10 }
 0x104   :  { %v498_v15 = vpop.f32.mrf.mxu0 }
 0x105   :  { %v539_v16 = vpop.f32.mrf.mxu1  ;;  %v538_v17 = vadd.f32 %v537_v13, %v497_v14  ;;  %v499_v18 = vadd.f32 %v498_v15, %v133_v11  ;;  %v1278_v11 = vld [vmem:[%s1988_s8] ss:$0 sm:$0xff] }
 0x106   :  { %v500_v19 = vpop.f32.mrf.mxu0 }
 0x107   :  { %v541_v20 = vpop.f32.mrf.mxu1  ;;  %v540_v21 = vadd.f32 %v539_v16, %v499_v18  ;;  %v544_v22 = vmax.f32 %v538_v17, 0.0 }
 0x108   :  { %v501_v23 = vpop.f32.mrf.mxu0 }
 0x109   :  { %v542_v24 = vpop.f32.mrf.mxu1  ;;  %v545_v25 = vmax.f32 %v540_v21, 0.0  ;;  %v546_v26 = vpack.c.bf16 %v544_v22, %v544_v22 }
 0x10b   :  { %v547_v44 = vpack.c.bf16 %v545_v25, %v545_v25 }
 0x10d   :  { %1249 = vmatprep.mubr.msk.bf16.mxu0 %vm710_vm3, %v547_v44 }
 0x10e   :  { %754 = vmatmul.mubr.bf16.vlgmr.msra.gmra.mxu0 %v546_v26 }
 0x10f   :  { %1096 = vmatpush1.bf16.msra.mxu0 %v1469_v31 }
 0x110   :  { %1097 = vmatprep.subr.bf16.mxu0 %v1509_v32 }
 0x113   :  { %1098 = vmatpush1.bf16.msra.mxu0 %v1470_v33 }
 0x114   :  { %1099 = vmatprep.subr.bf16.mxu0 %v1509_v32 }
 0x117   :  { %1100 = vmatpush1.bf16.msra.mxu0 %v1471_v34 }
 0x118   :  { %1101 = vmatprep.subr.bf16.mxu0 %v1509_v32 }
 0x11b   :  { %1102 = vmatpush1.bf16.msra.mxu0 %v1472_v35 }
 0x11c   :  { %1103 = vmatprep.subr.bf16.mxu0 %v1509_v32 }
 0x11f   :  { %1104 = vmatpush1.bf16.msra.mxu0 %v1473_v36 }
 0x120   :  { %1105 = vmatprep.subr.bf16.mxu0 %v1509_v32 }
 0x123   :  { %1106 = vmatpush1.bf16.msra.mxu0 %v1474_v37 }
 0x124   :  { %1107 = vmatprep.subr.bf16.mxu0 %v1509_v32 }
 0x127   :  { %1108 = vmatpush1.bf16.msra.mxu0 %v1475_v38 }
 0x128   :  { %1109 = vmatprep.subr.bf16.mxu0 %v1509_v32 }
 0x12b   :  { %1110 = vmatpush1.bf16.msra.mxu0 %v1476_v39 }
 0x12c   :  { %1117 = vmatprep.subr.bf16.mxu0 %v1509_v32 }
 0x12f   :  { %1118 = vmatpush2.bf16.msra.mxu0 %v1093_v41 }
 0x130   :  { %1119 = vmatprep.subr.bf16.mxu0 %v1509_v32 }
 0x133   :  { %1120 = vmatpush2.bf16.msra.mxu0 %v1478_v42 }
 0x134   :  { %1121 = vmatprep.subr.bf16.mxu0 %v1509_v32 }
 0x137   :  { %1122 = vmatpush2.bf16.msra.mxu0 %v1479_v43 }
 0x138   :  { %1123 = vmatprep.subr.bf16.mxu0 %v1509_v32 }
 0x13b   :  { %1124 = vmatpush2.bf16.msra.mxu0 %v1480_v58 }
 0x13c   :  { %1125 = vmatprep.subr.bf16.mxu0 %v1509_v32 }
 0x13f   :  { %1126 = vmatpush2.bf16.msra.mxu0 %v1481_v59 }
 0x1ce   :  { %v755_v48 = vpop.f32.mrf.mxu0 }
 0x1cf   :  { %v756_v49 = vadd.f32 %v755_v48, %v578_v46 }
 0x1d0   :  { %v757_v50 = vpop.f32.mrf.mxu0 }
 0x1d1   :  { %v758_v51 = vadd.f32 %v757_v50, %v582_v47  ;;  %v762_v52 = vmax.f32 %v756_v49, 0.0 }
 0x1d2   :  { %v759_v53 = vpop.f32.mrf.mxu0 }
 0x1d3   :  { %v763_v54 = vmax.f32 %v758_v51, 0.0  ;;  %v764_v57 = vpack.c.bf16 %v762_v52, %v762_v52 }
 0x1d4   :  { %v760_v55 = vpop.f32.mrf.mxu0 }
 0x1d5   :  { %v765_v56 = vpack.c.bf16 %v763_v54, %v763_v54 }
 0x1d7   :  { %1277 = vmatprep.mubr.msk.bf16.mxu1 %vm710_vm3, %v765_v56 }
 0x1d8   :  { %970 = vmatmul.mubr.bf16.vlgmr.msra.gmra.mxu1 %v764_v57 }
 0x298   :  { %v971_v63 = vpop.f32.mrf.mxu1 }
 0x299   :  { %v972_v0 = vadd.f32 %v971_v63, %v796_v61 }
 0x29a   :  { %v973_v1 = vpop.f32.mrf.mxu1 }
 0x29b   :  { %v974_v2 = vadd.f32 %v973_v1, %v800_v62  ;;  %v978_v3 = vmax.f32 %v972_v0, 0.0 }
 0x29c   :  { %v975_v4 = vpop.f32.mrf.mxu1 }
 0x29d   :  { %v979_v5 = vmax.f32 %v974_v2, 0.0  ;;  %v980_v10 = vpack.c.bf16 %v978_v3, %v978_v3 }
 0x29e   :  { %v976_v6 = vpop.f32.mrf.mxu1 }
 0x29f   :  { %v981_v8 = vpack.c.bf16 %v979_v5, %v979_v5 }
 0x2a1   :  { %1292 = vmatprep.mubr.msk.bf16.mxu0 %vm710_vm3, %v981_v8 }
 0x2a2   :  { %1128 = vmatmul.mubr.bf16.vlgmr.msra.gmra.mxu0 %v980_v10 }
 0x362   :  { %v1129_v7 = vpop.f32.mrf.mxu0 }
 0x363   :  { %v1130_v12 = vadd.f32 %v1278_v11, %v1129_v7 }
 0x364   :  { %v1131_v9 = vpop.f32.mrf.mxu0 }
 0x365   :  { %v1293_v13 = vmul.f32 -1.442695, %v1130_v12 }
 0x366   :  { %v1132_v14 = vpop.f32.mrf.mxu0 }
 0x367   :  { %1482 = vpow2.f32 %v1293_v13 }
 0x368   :  { %v1133_v15 = vpop.f32.mrf.mxu0 }
 0x374   :  { %v1483_v16 = vpop.eup %1482 }
 0x375   :  { %v1138_v17 = vadd.f32 1.0, %v1483_v16 }
 0x377   :  { %1484 = vrcp.f32 %v1138_v17 }
 0x384   :  { %v1485_v18 = vpop.eup %1484 }
 0x385   :  { %1141 = vst [vmem:[#allocation2] sm:$0x3] %v1485_v18 }
 0x386   :  { %1497 = shalt.err (!%p1494_p4)
}
 0x387   :  { %1151 = dma.vmem_to_hbm [thread:$0]  %s1149_s19, 32, %s1989_s9, [#allocation3]  }
 0x388   :  { %1506 = dma.done.wait [#allocation3], 32  }
 0x389   :  { %1507 = vsyncadd [#allocation3], 4294967264 }
 0x38a   :  { %1155 = vsyncpa [#allocation3], 1 }

</bundles_post_ra>
